<compile_context>
chip_gen: v7x
topology: tpu7x:2x2x1
jax: 0.10.0
libtpu: 0.0.40
codegen_flags: <defaults>
</compile_context>

<pallas_src>
import jax
import jax.numpy as jnp
from jax.experimental import pallas as pl
from jax.experimental.pallas import tpu as pltpu


def _round_up(n, m):
    return ((n + m - 1) // m) * m


def _padded_tile_bytes(rows, cols, itemsize=4):
    # (8, 128)-padded VMEM footprint of a 2-D f32 tile.
    return _round_up(max(rows, 1), 8) * _round_up(max(cols, 1), 128) * itemsize


def _mlp_kernel(xT_ref, w1T_ref, b1_ref, w2T_ref, b2_ref, oT_ref):
    """Fused Linear -> ReLU -> Linear in the transposed (lane-dense) layout.

    Shapes inside the kernel (tb = batch tile on the lane axis):
      xT_ref  : [F, tb]
      w1T_ref : [H, F]    b1_ref : [H, 1]
      w2T_ref : [O, H]    b2_ref : [O, 1]
      oT_ref  : [O, tb]
    Everything is f32 end-to-end.
    """
    xT = xT_ref[...]          # [F, tb]
    w1T = w1T_ref[...]        # [H, F]
    F = xT.shape[0]

    # --- Layer 1: K = F (tiny) -> unrolled broadcast FMAs on the VPU. -------
    if F <= 8:
        h = b1_ref[...]                               # [H, 1], broadcasts over lanes
        for f in range(F):                            # static unroll (trace-time)
            h = h + w1T[:, f:f + 1] * xT[f:f + 1, :]  # [H,1]*[1,tb] -> [H,tb]
    else:
        h = jnp.dot(w1T, xT, preferred_element_type=jnp.float32) + b1_ref[...]

    h = jnp.maximum(h, 0.0)                           # ReLU (f32)   [H, tb]

    # --- Layer 2: K = H -> MXU matmul, f32 accumulation. ---------------------
    y = jnp.dot(w2T_ref[...], h, preferred_element_type=jnp.float32)  # [O, tb]
    y = y + b2_ref[...]                                               # + [O, 1]
    oT_ref[...] = y.astype(oT_ref.dtype)


def net_forward(x, w1, b1, w2, b2, *, block_b=2048):
    """x: [B, F] f32; w1: [F, H]; b1: [H]; w2: [H, O]; b2: [O] -> [B, O] f32."""
    B, F = x.shape
    H = w1.shape[1]
    O = w2.shape[1]

    # Lane-dense layout: batch on lanes.  The wrapper-side transposes are pure
    # layout plumbing over tiny [B,F]/[O,B] arrays (F = O = 2).
    xT = x.T                     # [F, B]
    w1T = w1.T                   # [H, F]
    w2T = w2.T                   # [O, H]
    b1c = b1.reshape(H, 1)
    b2c = b2.reshape(O, 1)

    # Batch tile (lane axis).  Small B -> one grid step with full-extent blocks
    # (no pad, no post-slice).  Large B -> 128-aligned lane tiles; Pallas drops
    # the out-of-bounds writes of the ragged last block, which is safe because
    # each output column depends only on its own input column.
    if B <= block_b:
        tb = B
    else:
        tb = _round_up(min(block_b, B), 128)
    grid = (pl.cdiv(B, tb),)

    # VMEM budget from (8,128)-padded footprints, double-buffered, 2x slack.
    bytes_needed = (
        2 * _padded_tile_bytes(F, tb)        # xT tiles (double-buffered)
        + 2 * _padded_tile_bytes(O, tb)      # output tiles (double-buffered)
        + _padded_tile_bytes(H, tb)          # f32 hidden intermediate
        + 2 * (_padded_tile_bytes(H, F) + _padded_tile_bytes(H, 1)
               + _padded_tile_bytes(O, H) + _padded_tile_bytes(O, 1))
    )
    vmem_limit = int(min(max(2 * bytes_needed, 16 << 20), 32 << 20))

    outT = pl.pallas_call(
        _mlp_kernel,
        out_shape=jax.ShapeDtypeStruct((O, B), x.dtype),
        grid=grid,
        in_specs=[
            pl.BlockSpec((F, tb), lambda i: (0, i)),   # xT: tiled over batch (lanes)
            pl.BlockSpec((H, F), lambda i: (0, 0)),    # w1T: VMEM-resident
            pl.BlockSpec((H, 1), lambda i: (0, 0)),    # b1:  VMEM-resident
            pl.BlockSpec((O, H), lambda i: (0, 0)),    # w2T: VMEM-resident
            pl.BlockSpec((O, 1), lambda i: (0, 0)),    # b2:  VMEM-resident
        ],
        out_specs=pl.BlockSpec((O, tb), lambda i: (0, i)),
        compiler_params=pltpu.CompilerParams(
            dimension_semantics=("parallel",),   # sharded across TCs on v7x; no-op v5e/v6e
            vmem_limit_bytes=vmem_limit,
        ),
    )(xT, w1T, b1c, w2T, b2c)
    return outT.T                                # [B, O]


def init_params(key, n_feature, n_hidden, n_output):
    """Mimics PyTorch nn.Linear default init: U[-1/sqrt(fan_in), 1/sqrt(fan_in)]."""
    k1, k2, k3, k4 = jax.random.split(key, 4)
    lim1 = 1.0 / jnp.sqrt(jnp.float32(n_feature))
    lim2 = 1.0 / jnp.sqrt(jnp.float32(n_hidden))
    w1 = jax.random.uniform(k1, (n_feature, n_hidden), jnp.float32, -lim1, lim1)
    b1 = jax.random.uniform(k2, (n_hidden,), jnp.float32, -lim1, lim1)
    w2 = jax.random.uniform(k3, (n_hidden, n_output), jnp.float32, -lim2, lim2)
    b2 = jax.random.uniform(k4, (n_output,), jnp.float32, -lim2, lim2)
    return w1, b1, w2, b2


def _ref_forward(x, w1, b1, w2, b2):
    """Plain-JAX f32 reference (highest-precision matmuls)."""
    hp = jax.lax.Precision.HIGHEST
    h = jnp.maximum(jnp.dot(x, w1, precision=hp) + b1, 0.0)
    return jnp.dot(h, w2, precision=hp) + b2


if __name__ == "__main__":
    # Shapes consistent with the original script: x is cat of two 100x2
    # Gaussian blobs at +/-2; Net(n_feature=2, n_hidden=32, n_output=2).
    n_per_blob, n_feature, n_hidden, n_output = 100, 2, 32, 2
    B = 2 * n_per_blob

    key = jax.random.PRNGKey(0)
    kx0, kx1, kp = jax.random.split(key, 3)

    x0 = 2.0 + jax.random.normal(kx0, (n_per_blob, n_feature), jnp.float32)
    x1 = -2.0 + jax.random.normal(kx1, (n_per_blob, n_feature), jnp.float32)
    x = jnp.concatenate([x0, x1], axis=0)

    w1, b1, w2, b2 = init_params(kp, n_feature, n_hidden, n_output)

    out = net_forward(x, w1, b1, w2, b2)
    jax.block_until_ready(out)

    assert out.shape == (B, n_output)

    # f32 end-to-end in the kernel -> tight tolerance vs. the f32 reference.
    ref = _ref_forward(x, w1, b1, w2, b2)
    assert jnp.allclose(out, ref, atol=1e-3, rtol=1e-3), float(
        jnp.max(jnp.abs(out - ref)))

    print("KERNEL_OK")
</pallas_src>

<mosaic_0001>
module attributes {stable_mosaic.version = 11 : i64} {
  func.func @_mlp_kernel(%arg0: i32, %arg1: memref<2x200xf32, #tpu.memory_space<vmem>>, %arg2: memref<32x2xf32, #tpu.memory_space<vmem>>, %arg3: memref<32x1xf32, #tpu.memory_space<vmem>>, %arg4: memref<2x32xf32, #tpu.memory_space<vmem>>, %arg5: memref<2x1xf32, #tpu.memory_space<vmem>>, %arg6: memref<2x200xf32, #tpu.memory_space<vmem>>) attributes {dimension_semantics = [#tpu.dimension_semantics<parallel>], iteration_bounds = array<i64: 1>, scalar_prefetch = 0 : i64, scratch_operands = 0 : i64, tpu.core_type = #tpu.core_type<tc>, window_params = [{transform_indices = @transform_0, window_bounds = array<i64: 2, 200>}, {pipeline_mode = #tpu.pipeline_mode<synchronous>, transform_indices = @transform_1, window_bounds = array<i64: 32, 2>}, {pipeline_mode = #tpu.pipeline_mode<synchronous>, transform_indices = @transform_2, window_bounds = array<i64: 32, 1>}, {pipeline_mode = #tpu.pipeline_mode<synchronous>, transform_indices = @transform_3, window_bounds = array<i64: 2, 32>}, {pipeline_mode = #tpu.pipeline_mode<synchronous>, transform_indices = @transform_4, window_bounds = array<i64: 2, 1>}, {transform_indices = @transform_5, window_bounds = array<i64: 2, 200>}]} {
    %c0 = arith.constant 0 : index
    %c0_0 = arith.constant 0 : index
    %0 = vector.load %arg1[%c0, %c0_0] : memref<2x200xf32, #tpu.memory_space<vmem>>, vector<2x200xf32>
    %c0_1 = arith.constant 0 : index
    %c0_2 = arith.constant 0 : index
    %1 = vector.load %arg2[%c0_1, %c0_2] : memref<32x2xf32, #tpu.memory_space<vmem>>, vector<32x2xf32>
    %c0_3 = arith.constant 0 : index
    %c0_4 = arith.constant 0 : index
    %2 = vector.load %arg3[%c0_3, %c0_4] : memref<32x1xf32, #tpu.memory_space<vmem>>, vector<32x1xf32>
    %3 = vector.extract_strided_slice %1 {offsets = [0, 0], sizes = [32, 1], strides = [1, 1]} : vector<32x2xf32> to vector<32x1xf32>
    %4 = vector.extract_strided_slice %0 {offsets = [0, 0], sizes = [1, 200], strides = [1, 1]} : vector<2x200xf32> to vector<1x200xf32>
    %5 = vector.broadcast %3 : vector<32x1xf32> to vector<32x200xf32>
    %6 = vector.broadcast %4 : vector<1x200xf32> to vector<32x200xf32>
    %7 = arith.mulf %5, %6 : vector<32x200xf32>
    %8 = vector.broadcast %2 : vector<32x1xf32> to vector<32x200xf32>
    %9 = arith.addf %8, %7 : vector<32x200xf32>
    %10 = vector.extract_strided_slice %1 {offsets = [0, 1], sizes = [32, 1], strides = [1, 1]} : vector<32x2xf32> to vector<32x1xf32>
    %11 = vector.extract_strided_slice %0 {offsets = [1, 0], sizes = [1, 200], strides = [1, 1]} : vector<2x200xf32> to vector<1x200xf32>
    %12 = vector.broadcast %10 : vector<32x1xf32> to vector<32x200xf32>
    %13 = vector.broadcast %11 : vector<1x200xf32> to vector<32x200xf32>
    %14 = arith.mulf %12, %13 : vector<32x200xf32>
    %15 = arith.addf %9, %14 : vector<32x200xf32>
    %cst = arith.constant 0.000000e+00 : f32
    %16 = vector.broadcast %cst : f32 to vector<32x200xf32>
    %17 = arith.maximumf %15, %16 : vector<32x200xf32>
    %c0_5 = arith.constant 0 : index
    %c0_6 = arith.constant 0 : index
    %18 = vector.load %arg4[%c0_5, %c0_6] : memref<2x32xf32, #tpu.memory_space<vmem>>, vector<2x32xf32>
    %cst_7 = arith.constant dense<0.000000e+00> : vector<2x200xf32>
    %19 = tpu.matmul %18, %17, %cst_7 {dimension_numbers = #tpu.dot_dimension_numbers<[1], [0], [0], [1], [0, 0, 1, 1], [], []>} : vector<2x32xf32>, vector<32x200xf32>, vector<2x200xf32> -> vector<2x200xf32>
    %c0_8 = arith.constant 0 : index
    %c0_9 = arith.constant 0 : index
    %20 = vector.load %arg5[%c0_8, %c0_9] : memref<2x1xf32, #tpu.memory_space<vmem>>, vector<2x1xf32>
    %21 = vector.broadcast %20 : vector<2x1xf32> to vector<2x200xf32>
    %22 = arith.addf %19, %21 : vector<2x200xf32>
    %c0_10 = arith.constant 0 : index
    %c0_11 = arith.constant 0 : index
    %23 = vector.load %arg6[%c0_10, %c0_11] : memref<2x200xf32, #tpu.memory_space<vmem>>, vector<2x200xf32>
    tpu.vector_store %arg6[%c0_10, %c0_11], %22 {strides = array<i32>} : memref<2x200xf32, #tpu.memory_space<vmem>>, vector<2x200xf32>,
    return
  }
  func.func @transform_0(%arg0: i32) -> (i32, i32) {
    %c0_i32 = arith.constant 0 : i32
    %c0_i32_0 = arith.constant 0 : i32
    return %c0_i32, %arg0 : i32, i32
  }
  func.func @transform_1(%arg0: i32) -> (i32, i32) {
    %c0_i32 = arith.constant 0 : i32
    %c0_i32_0 = arith.constant 0 : i32
    %c0_i32_1 = arith.constant 0 : i32
    return %c0_i32, %c0_i32_0 : i32, i32
  }
  func.func @transform_2(%arg0: i32) -> (i32, i32) {
    %c0_i32 = arith.constant 0 : i32
    %c0_i32_0 = arith.constant 0 : i32
    %c0_i32_1 = arith.constant 0 : i32
    return %c0_i32, %c0_i32_0 : i32, i32
  }
  func.func @transform_3(%arg0: i32) -> (i32, i32) {
    %c0_i32 = arith.constant 0 : i32
    %c0_i32_0 = arith.constant 0 : i32
    %c0_i32_1 = arith.constant 0 : i32
    return %c0_i32, %c0_i32_0 : i32, i32
  }
  func.func @transform_4(%arg0: i32) -> (i32, i32) {
    %c0_i32 = arith.constant 0 : i32
    %c0_i32_0 = arith.constant 0 : i32
    %c0_i32_1 = arith.constant 0 : i32
    return %c0_i32, %c0_i32_0 : i32, i32
  }
  func.func @transform_5(%arg0: i32) -> (i32, i32) {
    %c0_i32 = arith.constant 0 : i32
    %c0_i32_0 = arith.constant 0 : i32
    return %c0_i32, %arg0 : i32, i32
  }
}

</mosaic_0001>

<bundles_post_ra>
// kernel: tpu_custom_call.1
= control target key start
LH: loop header
LB: loop body
LE: loop exit
PB: predicated region body
PF: predicated region fallthrough
CT: control target
= control target key end

     0   :  { %v320_v2 = vmov 0   ;;  %s407_s0 = inlined_call_operand.vmem [shape: f32[2,200], index: 0, kind: input, shape index: {}]   ;;  %s408_s1 = inlined_call_operand.vmem [shape: f32[32,2], index: 1, kind: input, shape index: {}]   ;;  %s409_s2 = inlined_call_operand.vmem [shape: f32[32,1], index: 2, kind: input, shape index: {}]   ;;  %s410_s3 = inlined_call_operand.vmem [shape: f32[2,32], index: 3, kind: input, shape index: {}]   ;;  %s411_s4 = inlined_call_operand.vmem [shape: f32[2,1], index: 4, kind: input, shape index: {}]   ;;  %s412_s5 = inlined_call_operand.hbm [shape: f32[2,200], index: 5, kind: output, shape index: {}]  }
   0x1   :  { %v26_v0 = vld [vmem:[%s409_s2] sm:$0xff]  ;;  %289 = vset.pattern.permute.xlu1 %v320_v2  ;;  %288 = vset.pattern.permute.xlu0 %v320_v2  ;;  %v27_v3 = vld [vmem:[%s409_s2 + $0x8] sm:$0xff] }
   0x2   :  { %v22_v1 = vld [vmem:[%s408_s1] sm:$0xff]  ;;  %79 = vperm.xlu1 %289, %v26_v0   ;;  %v23_v4 = vld [vmem:[%s408_s1 + $0x8] sm:$0xff] }
   0x3   :  { %32 = vperm.xlu0 %288, %v22_v1  }
   0x4   :  { %10 = vsyncpa [#allocation3], 0  ;;  %v25_v5 = vld [vmem:[%s408_s1 + $0x18] sm:$0xff]  ;;  %v321_v6 = vmov 1   ;;  %v24_v7 = vld [vmem:[%s408_s1 + $0x10] sm:$0xff]  ;;  %v322_v10 = vmov 0.0   ;;  %v51_v12 = vlaneseq }
   0x5   :  { %v28_v8 = vld [vmem:[%s409_s2 + $0x10] sm:$0xff]  ;;  %v29_v9 = vld [vmem:[%s409_s2 + $0x18] sm:$0xff]  ;;  %238 = vmatprep.mubr.f32.mxu0 %v322_v10  ;;  %v164_v11 = vld [vmem:[%s411_s4] sm:$0x3]  ;;  %vm170_vm0 = vcmask 261120   ;;  %vm256_vm1 = vcmask 1041408  }
   0x6   :  { %84 = vperm.xlu1 %289, %v27_v3   ;;  %v382_v13 = vshrl.u32 %v51_v12, 7  ;;  %v21_v16 = vld [vmem:[%s407_s0] sm:$0xf]  ;;  %vm257_vm2 = vcmask 584706   ;;  %s324_s11 = smov [#allocation2]  }
   0x7   :  { %37 = vperm.xlu0 %288, %v23_v4   ;;  %s266_s12 = sshll.u32 %s324_s11, 4  ;;  %vm258_vm3 = vmor %vm257_vm2, %vm256_vm1  ;;  %s267_s12 = int_to_ptr.vmem [resolvable:$true] %s266_s12 }
   0x8   :  { %v53_v14 = vsub.s32 0, %v382_v13  ;;  %v57_v15 = vsub.s32 2, %v382_v13  ;;  %v123_v17 = vsub.s32 1, %v382_v13  ;;  %v127_v18 = vsub.s32 3, %v382_v13  ;;  %p301_p1 = scmp.lt.s32.totalorder %s267_s12, %s267_s12 }
   0xa   :  { %290 = vset.pattern.permute.xlu1 %v321_v6  ;;  %v54_v21 = vrot.slane %v21_v16, %v53_v14  ;;  %v58_v22 = vrot.slane %v21_v16, %v57_v15  ;;  %v124_v23 = vrot.slane %v21_v16, %v123_v17  ;;  %v128_v24 = vrot.slane %v21_v16, %v127_v18 }
   0xb   :  { %47 = vperm.xlu0 %288, %v25_v5   ;;  %110 = vperm.xlu1 %290, %v23_v4  }
   0xc   :  { %v64_v27 = vrot.slane %v54_v21, %v53_v14  ;;  %v68_v28 = vrot.slane %v58_v22, %v53_v14  ;;  %v134_v29 = vrot.slane %v124_v23, %v123_v17  ;;  %v138_v30 = vrot.slane %v128_v24, %v123_v17 }
   0xd   :  { %v323_v21 = vmov 1983009808  }
   0xe   :  { %v249_v22 = vunpack.c.l.s4 %v323_v21 }
   0xf   :  { %292 = vset.pattern.permute.xlu0 %v321_v6  ;;  %291 = vset.pattern.permute.xlu1 %v320_v2 }
  0x10   :  { %106 = vperm.xlu0 %292, %v22_v1   ;;  %42 = vperm.xlu1 %291, %v24_v7   ;;  %v250_v24 = vunpack.c.0.s8 %v249_v22 }
  0x14   :  { %114 = vperm.xlu0 %292, %v24_v7   ;;  %89 = vperm.xlu1 %291, %v28_v8  }
  0x18   :  { %295 = vset.pattern.permute.xlu0 %v320_v2  ;;  %94 = vperm.xlu1 %291, %v29_v9  }
  0x1c   :  { %293 = vset.pattern.permute.xlu1 %v321_v6 }
  0x1d   :  { %118 = vperm.xlu1 %293, %v25_v5  }
  0x21   :  { %294 = vset.pattern.permute.xlu1 %v320_v2 }
  0x22   :  { %167 = vperm.xlu1 %294, %v164_v11  }
  0x81   :  { %v80_v19 = vpop.permute.xlu1 %79 }
  0x82   :  { %v33_v20 = vpop.permute.xlu0 %32 }
  0x83   :  { %v69_v34 = vmul.f32 %v64_v27, %v33_v20  ;;  %v70_v35 = vmul.f32 %v68_v28, %v33_v20  ;;  %v163_v20 = vld [vmem:[%s410_s3] sm:$0x3]  ;;  %s296_s3 = scalar_lea.vmem %s267_s12, 64 }
  0x84   :  { %p297_p0 = scmp.ne.s32.totalorder %s267_s12, %s296_s3  ;;  %p302_p2 = scmp.lt.s32.totalorder %s296_s3, %s296_s3 }
  0x85   :  { %v85_v25 = vpop.permute.xlu1 %84  ;;  %v97_v41 = vadd.f32 %v80_v19, %v69_v34  ;;  %v98_v42 = vadd.f32 %v80_v19, %v70_v35 }
  0x86   :  { %v38_v26 = vpop.permute.xlu0 %37  ;;  %p303_p3 = por %p302_p2, %p301_p1 }
  0x87   :  { %v71_v31 = vmul.f32 %v64_v27, %v38_v26  ;;  %v72_v32 = vmul.f32 %v68_v28, %v38_v26 }
  0x88   :  { %p304_p4 = pnand %p303_p3, %p297_p0 }
  0x89   :  { %v99_v39 = vadd.f32 %v85_v25, %v71_v31  ;;  %v100_v40 = vadd.f32 %v85_v25, %v72_v32 }
  0x8a   :  { %v48_v33 = vpop.permute.xlu0 %47  ;;  %v111_v36 = vpop.permute.xlu1 %110 }
  0x8b   :  { %v141_v37 = vmul.f32 %v134_v29, %v111_v36  ;;  %v142_v38 = vmul.f32 %v138_v30, %v111_v36  ;;  %v75_v2 = vmul.f32 %v64_v27, %v48_v33  ;;  %v76_v3 = vmul.f32 %v68_v28, %v48_v33 }
  0x8d   :  { %v149_v44 = vadd.f32 %v141_v37, %v99_v39  ;;  %v150_v48 = vadd.f32 %v142_v38, %v100_v40 }
  0x8f   :  { %v107_v43 = vpop.permute.xlu0 %106  ;;  %v43_v47 = vpop.permute.xlu1 %42  ;;  %v158_v53 = vmax.f32 %v150_v48, 0.0  ;;  %v157_v55 = vmax.f32 %v149_v44, 0.0 }
  0x90   :  { %v139_v45 = vmul.f32 %v134_v29, %v107_v43  ;;  %v140_v46 = vmul.f32 %v138_v30, %v107_v43  ;;  %v73_v59 = vmul.f32 %v64_v27, %v43_v47  ;;  %v74_v60 = vmul.f32 %v68_v28, %v43_v47 }
  0x92   :  { %v147_v49 = vadd.f32 %v139_v45, %v97_v41  ;;  %v148_v50 = vadd.f32 %v140_v46, %v98_v42 }
  0x93   :  { %v90_v51 = vpop.permute.xlu1 %89  ;;  %v115_v56 = vpop.permute.xlu0 %114 }
  0x94   :  { %v156_v52 = vmax.f32 %v148_v50, 0.0  ;;  %v155_v54 = vmax.f32 %v147_v49, 0.0  ;;  %v101_v62 = vadd.f32 %v90_v51, %v73_v59  ;;  %v102_v63 = vadd.f32 %v90_v51, %v74_v60 }
  0x95   :  { %v143_v0 = vmul.f32 %v134_v29, %v115_v56  ;;  %v144_v1 = vmul.f32 %v138_v30, %v115_v56 }
  0x96   :  { %v275_v57 = vpack.c.bf16 %v158_v53, %v156_v52  ;;  %v277_v58 = vpack.c.bf16 %v157_v55, %v155_v54 }
  0x97   :  { %v95_v61 = vpop.permute.xlu1 %94  ;;  %v151_v4 = vadd.f32 %v143_v0, %v101_v62  ;;  %v152_v5 = vadd.f32 %v144_v1, %v102_v63 }
  0x98   :  { %276 = vmatprep.subr.bf16.mxu0 %v275_v57  ;;  %v103_v7 = vadd.f32 %v95_v61, %v75_v2  ;;  %v104_v8 = vadd.f32 %v95_v61, %v76_v3 }
  0x99   :  { %278 = vmatpush1.bf16.msra.mxu0 %v277_v58  ;;  %v159_v14 = vmax.f32 %v151_v4, 0.0  ;;  %v160_v15 = vmax.f32 %v152_v5, 0.0 }
  0x9c   :  { %v119_v6 = vpop.permute.xlu1 %118 }
  0x9d   :  { %v145_v9 = vmul.f32 %v134_v29, %v119_v6  ;;  %v146_v10 = vmul.f32 %v138_v30, %v119_v6  ;;  %v253_v29 = vsub.s32 %v250_v24, %v382_v13 }
  0x9f   :  { %v153_v11 = vadd.f32 %v145_v9, %v103_v7  ;;  %v154_v12 = vadd.f32 %v146_v10, %v104_v8 }
  0xa1   :  { %v161_v16 = vmax.f32 %v153_v11, 0.0  ;;  %v162_v17 = vmax.f32 %v154_v12, 0.0  ;;  %v168_v23 = vpop.permute.xlu1 %167 }
  0xa3   :  { %v279_v18 = vpack.c.bf16 %v162_v17, %v160_v15  ;;  %v281_v19 = vpack.c.bf16 %v161_v16, %v159_v14 }
  0xa5   :  { %280 = vmatprep.subr.bf16.mxu0 %v279_v18 }
  0xa6   :  { %282 = vmatpush1.bf16.msra.mxu0 %v281_v19 }
  0xa9   :  { %274 = vmatmul.mubr.msk.f32.vlgmr.msra.gmra.mrb[0].mxu0 %vm170_vm0, %v163_v20 }
 0x17c   :  { %v240_v25 = vpop.f32.mrb[0].mxu0 }
 0x17d   :  { %v241_v26 = vadd.f32 %v240_v25, %v168_v23  ;;  %v242_v27 = vpop.f32.mrb[1].mxu0 }
 0x17e   :  { %v243_v28 = vadd.f32 %v242_v27, %v168_v23 }
 0x180   :  { %v247_v30 = vcombine.low %v241_v26, %v243_v28 }
 0x182   :  { %v254_v31 = vrot.slane %v247_v30, %v253_v29 }
 0x184   :  { %259 = vst.msk [vmem:[#allocation2] sm:$0xf] %vm258_vm3, %v254_v31 }
 0x185   :  { %307 = shalt.err (!%p304_p4)
}
 0x186   :  { %s308_s15 = scalar_lea.hbm %s412_s5, 64 }
 0x187   :  { %p309_p5 = scmp.ne.s32.totalorder %s412_s5, %s308_s15  ;;  %p312_p6 = scmp.lt.u32.totalorder %s308_s15, %s412_s5 }
 0x189   :  { %p314_p7 = pnand %p312_p6, %p309_p5 }
 0x18b   :  { %317 = shalt.err (!%p314_p7)
}
 0x18c   :  { %269 = dma.vmem_to_hbm [thread:$0]  %s267_s12, 64, %s412_s5, [#allocation3]  }
 0x18d   :  { %318 = dma.done.wait [#allocation3], 64  }
 0x18e   :  { %319 = vsyncadd [#allocation3], 4294967232 }
 0x18f   :  { %273 = vsyncpa [#allocation3], 1 }

</bundles_post_ra>
